<compile_context>
chip_gen: v5e
topology: v5e:2x2
jax: 0.10.0
libtpu: 0.0.40
codegen_flags: <defaults>
</compile_context>

<pallas_src>
import jax
import jax.numpy as jnp
from jax.experimental import pallas as pl
from jax.experimental.pallas import tpu as pltpu


def _round_up(n, m):
    return ((n + m - 1) // m) * m


def _elu(x):
    # nn.ELU(alpha=1.0).  exp(x)-1 kept (instead of expm1) for Mosaic lowering portability.
    return jnp.where(x > 0.0, x, jnp.exp(x) - 1.0)


def make_actor_kernel(num_hidden_layers, action_size):
    """MLP with `num_hidden_layers` ELU hidden layers + output linear + one-hot sample."""
    n_linear = num_hidden_layers + 1

    def kernel(x_ref, g_ref, *rest):
        param_refs = rest[: 2 * n_linear]
        out_ref = rest[2 * n_linear]

        # Hidden layers: Linear(bf16 operands, f32 accumulate) + ELU (f32).
        h = x_ref[...]  # bf16
        for i in range(num_hidden_layers):
            w = param_refs[2 * i][...]           # bf16 (in, out)
            b = param_refs[2 * i + 1][...]       # f32  (1, out)
            h = jnp.dot(h, w, preferred_element_type=jnp.float32) + b
            h = _elu(h).astype(jnp.bfloat16)

        # Output layer -> logits (f32).
        w = param_refs[2 * num_hidden_layers][...]
        b = param_refs[2 * num_hidden_layers + 1][...]
        logits = jnp.dot(h, w, preferred_element_type=jnp.float32) + b

        # OneHotCategorical(logits).probs == softmax(logits).
        m = jnp.max(logits, axis=-1, keepdims=True)
        e = jnp.exp(logits - m)
        denom = jnp.sum(e, axis=-1, keepdims=True)
        probs = e * pl.reciprocal(denom, approx=True)

        # Gumbel-max sample, tie-safe: pick the FIRST lane attaining the max.
        z = logits + g_ref[...]
        zmax = jnp.max(z, axis=-1, keepdims=True)
        lane = jax.lax.broadcasted_iota(jnp.int32, z.shape, 1)
        cand = jnp.where(z >= zmax, lane, action_size)       # sentinel past last lane
        first = jnp.min(cand, axis=-1, keepdims=True)
        sample = (lane == first).astype(jnp.float32)

        # Packed, lane-dense store: [action | probs | logits].
        out_ref[...] = jnp.concatenate([sample, probs, logits], axis=-1)

    return kernel


class DiscreteActionModelPallas:
    def __init__(self, action_size, deter_size, stoch_size, embedding_size,
                 actor_info, expl_info, key):
        self.action_size = action_size
        self.deter_size = deter_size
        self.stoch_size = stoch_size
        self.embedding_size = embedding_size  # unused in forward (matches PyTorch)
        self.layers = actor_info["layers"]
        self.node_size = actor_info["node_size"]
        self.dist = actor_info["dist"]
        assert self.dist == "one_hot"
        self.expl_info = expl_info

        # PyTorch nn.Linear-style uniform(-1/sqrt(fan_in), 1/sqrt(fan_in)) init.
        # Weights stored as bf16 (MXU-native, half the VMEM/HBM traffic); biases f32.
        in_dim = deter_size + stoch_size
        dims = [in_dim] + [self.node_size] * self.layers + [action_size]
        self.params = []
        for i in range(len(dims) - 1):
            key, kw, kb = jax.random.split(key, 3)
            bound = 1.0 / (dims[i] ** 0.5)
            w = jax.random.uniform(kw, (dims[i], dims[i + 1]),
                                   minval=-bound, maxval=bound,
                                   dtype=jnp.float32).astype(jnp.bfloat16)
            b = jax.random.uniform(kb, (1, dims[i + 1]),
                                   minval=-bound, maxval=bound, dtype=jnp.float32)
            self.params += [w, b]

    def forward(self, model_state, key):
        B, D = model_state.shape
        A = self.action_size

        # Batch tile: multiple of 8 sublanes, capped so (params + double-buffered
        # x/noise/out tiles) stay comfortably inside v7x's 64 MiB VMEM.
        TB = min(256, _round_up(max(B, 1), 8))
        B_pad = _round_up(B, TB)

        x = model_state.astype(jnp.bfloat16)
        g = jax.random.gumbel(key, (B, A), dtype=jnp.float32)
        if B_pad != B:
            pad = B_pad - B
            x = jnp.pad(x, ((0, pad), (0, 0)))
            g = jnp.pad(g, ((0, pad), (0, 0)))

        kernel = make_actor_kernel(self.layers, A)

        in_specs = [
            pl.BlockSpec((TB, D), lambda i: (i, 0)),   # model_state tile (bf16)
            pl.BlockSpec((TB, A), lambda i: (i, 0)),   # gumbel noise tile (f32)
        ]
        # Weights/biases: whole-array VMEM blocks, resident across all grid steps.
        in_specs += [pl.BlockSpec(p.shape, lambda i: (0, 0)) for p in self.params]
        out_spec = pl.BlockSpec((TB, 3 * A), lambda i: (i, 0))

        # VMEM budget: params + double-buffered input/output tiles, with margin,
        # clamped under the v7x 64 MiB physical ceiling.
        param_bytes = sum(int(p.size) * p.dtype.itemsize for p in self.params)
        tile_bytes = 2 * (TB * D * 2 + TB * A * 4 + TB * 3 * A * 4)
        vmem_limit = int(min(48 * 1024 * 1024,
                             max(16 * 1024 * 1024,
                                 4 * (param_bytes + tile_bytes))))

        f = pl.pallas_call(
            kernel,
            out_shape=jax.ShapeDtypeStruct((B_pad, 3 * A), jnp.float32),
            grid=(B_pad // TB,),
            in_specs=in_specs,
            out_specs=out_spec,
            compiler_params=pltpu.CompilerParams(
                dimension_semantics=("parallel",),   # megacore sharding on v7x
                vmem_limit_bytes=vmem_limit),
        )
        packed = f(x, g, *self.params)[:B]
        action = packed[:, :A]
        probs = packed[:, A:2 * A]
        logits = packed[:, 2 * A:]
        # "action_dist" is represented by (probs, logits).
        return action, (probs, logits)

    # TODO(synk): add_exploration uses host-side np.random + dynamic indexing; kept out of the kernel.


def _reference_mlp(x, params, layers):
    # Mirrors the kernel's dtype choices (bf16 matmul operands, f32 accumulation).
    h = x.astype(jnp.bfloat16)
    for i in range(layers):
        h = jnp.dot(h, params[2 * i], preferred_element_type=jnp.float32) + params[2 * i + 1]
        h = jnp.where(h > 0.0, h, jnp.exp(h) - 1.0).astype(jnp.bfloat16)
    return jnp.dot(h, params[2 * layers],
                   preferred_element_type=jnp.float32) + params[2 * layers + 1]


if __name__ == "__main__":
    key = jax.random.PRNGKey(0)
    key, k_param, k_state, k_sample = jax.random.split(key, 4)

    # Small shapes consistent with the module.
    action_size = 6
    deter_size = 24
    stoch_size = 8
    embedding_size = 32
    actor_info = {"layers": 2, "node_size": 32, "activation": "elu", "dist": "one_hot"}
    expl_info = {"train_noise": 0.4, "eval_noise": 0.0, "expl_min": 0.05,
                 "expl_decay": 7000.0, "expl_type": "epsilon_greedy"}
    B = 8

    model = DiscreteActionModelPallas(action_size, deter_size, stoch_size,
                                      embedding_size, actor_info, expl_info, k_param)

    model_state = jax.random.normal(k_state, (B, deter_size + stoch_size),
                                    dtype=jnp.float32)

    action, (probs, logits) = model.forward(model_state, k_sample)
    jax.block_until_ready((action, probs, logits))

    # Sanity checks against a pure-JAX reference.
    ref_logits = _reference_mlp(model_state, model.params, actor_info["layers"])
    ref_probs = jax.nn.softmax(ref_logits, axis=-1)
    assert jnp.allclose(logits, ref_logits, atol=1e-2, rtol=1e-2)
    assert jnp.allclose(probs, ref_probs, atol=1e-2, rtol=1e-2)
    # action rows are exactly one-hot
    assert jnp.allclose(jnp.sum(action, axis=-1), 1.0, atol=1e-6)
    assert bool(jnp.all((action == 0.0) | (action == 1.0)))

    print("KERNEL_OK")
</pallas_src>

<mosaic_0001>
module attributes {stable_mosaic.version = 11 : i64} {
  func.func @kernel(%arg0: i32, %arg1: memref<8x32xbf16, #tpu.memory_space<vmem>>, %arg2: memref<8x6xf32, #tpu.memory_space<vmem>>, %arg3: memref<32x32xbf16, #tpu.memory_space<vmem>>, %arg4: memref<1x32xf32, #tpu.memory_space<vmem>>, %arg5: memref<32x32xbf16, #tpu.memory_space<vmem>>, %arg6: memref<1x32xf32, #tpu.memory_space<vmem>>, %arg7: memref<32x6xbf16, #tpu.memory_space<vmem>>, %arg8: memref<1x6xf32, #tpu.memory_space<vmem>>, %arg9: memref<8x18xf32, #tpu.memory_space<vmem>>) attributes {dimension_semantics = [#tpu.dimension_semantics<parallel>], iteration_bounds = array<i64: 1>, scalar_prefetch = 0 : i64, scratch_operands = 0 : i64, tpu.core_type = #tpu.core_type<tc>, window_params = [{transform_indices = @transform_0, window_bounds = array<i64: 8, 32>}, {transform_indices = @transform_1, window_bounds = array<i64: 8, 6>}, {pipeline_mode = #tpu.pipeline_mode<synchronous>, transform_indices = @transform_2, window_bounds = array<i64: 32, 32>}, {pipeline_mode = #tpu.pipeline_mode<synchronous>, transform_indices = @transform_3, window_bounds = array<i64: 1, 32>}, {pipeline_mode = #tpu.pipeline_mode<synchronous>, transform_indices = @transform_4, window_bounds = array<i64: 32, 32>}, {pipeline_mode = #tpu.pipeline_mode<synchronous>, transform_indices = @transform_5, window_bounds = array<i64: 1, 32>}, {pipeline_mode = #tpu.pipeline_mode<synchronous>, transform_indices = @transform_6, window_bounds = array<i64: 32, 6>}, {pipeline_mode = #tpu.pipeline_mode<synchronous>, transform_indices = @transform_7, window_bounds = array<i64: 1, 6>}, {transform_indices = @transform_8, window_bounds = array<i64: 8, 18>}]} {
    %c0 = arith.constant 0 : index
    %c0_0 = arith.constant 0 : index
    %0 = vector.load %arg1[%c0, %c0_0] : memref<8x32xbf16, #tpu.memory_space<vmem>>, vector<8x32xbf16>
    %c0_1 = arith.constant 0 : index
    %c0_2 = arith.constant 0 : index
    %1 = vector.load %arg3[%c0_1, %c0_2] : memref<32x32xbf16, #tpu.memory_space<vmem>>, vector<32x32xbf16>
    %c0_3 = arith.constant 0 : index
    %c0_4 = arith.constant 0 : index
    %2 = vector.load %arg4[%c0_3, %c0_4] : memref<1x32xf32, #tpu.memory_space<vmem>>, vector<1x32xf32>
    %cst = arith.constant dense<0.000000e+00> : vector<8x32xf32>
    %3 = tpu.matmul %0, %1, %cst {dimension_numbers = #tpu.dot_dimension_numbers<[1], [0], [0], [1], [0, 0, 1, 1], [], []>} : vector<8x32xbf16>, vector<32x32xbf16>, vector<8x32xf32> -> vector<8x32xf32>
    %4 = vector.broadcast %2 : vector<1x32xf32> to vector<8x32xf32>
    %5 = arith.addf %3, %4 : vector<8x32xf32>
    %cst_5 = arith.constant 0.000000e+00 : f32
    %6 = vector.broadcast %cst_5 : f32 to vector<8x32xf32>
    %7 = arith.cmpf ogt, %5, %6 : vector<8x32xf32>
    %8 = math.exp %5 : vector<8x32xf32>
    %cst_6 = arith.constant 1.000000e+00 : f32
    %9 = vector.broadcast %cst_6 : f32 to vector<8x32xf32>
    %10 = arith.subf %8, %9 : vector<8x32xf32>
    %11 = arith.select %7, %5, %10 : vector<8x32xi1>, vector<8x32xf32>
    %12 = arith.truncf %11 : vector<8x32xf32> to vector<8x32xbf16>
    %c0_7 = arith.constant 0 : index
    %c0_8 = arith.constant 0 : index
    %13 = vector.load %arg5[%c0_7, %c0_8] : memref<32x32xbf16, #tpu.memory_space<vmem>>, vector<32x32xbf16>
    %c0_9 = arith.constant 0 : index
    %c0_10 = arith.constant 0 : index
    %14 = vector.load %arg6[%c0_9, %c0_10] : memref<1x32xf32, #tpu.memory_space<vmem>>, vector<1x32xf32>
    %cst_11 = arith.constant dense<0.000000e+00> : vector<8x32xf32>
    %15 = tpu.matmul %12, %13, %cst_11 {dimension_numbers = #tpu.dot_dimension_numbers<[1], [0], [0], [1], [0, 0, 1, 1], [], []>} : vector<8x32xbf16>, vector<32x32xbf16>, vector<8x32xf32> -> vector<8x32xf32>
    %16 = vector.broadcast %14 : vector<1x32xf32> to vector<8x32xf32>
    %17 = arith.addf %15, %16 : vector<8x32xf32>
    %cst_12 = arith.constant 0.000000e+00 : f32
    %18 = vector.broadcast %cst_12 : f32 to vector<8x32xf32>
    %19 = arith.cmpf ogt, %17, %18 : vector<8x32xf32>
    %20 = math.exp %17 : vector<8x32xf32>
    %cst_13 = arith.constant 1.000000e+00 : f32
    %21 = vector.broadcast %cst_13 : f32 to vector<8x32xf32>
    %22 = arith.subf %20, %21 : vector<8x32xf32>
    %23 = arith.select %19, %17, %22 : vector<8x32xi1>, vector<8x32xf32>
    %24 = arith.truncf %23 : vector<8x32xf32> to vector<8x32xbf16>
    %c0_14 = arith.constant 0 : index
    %c0_15 = arith.constant 0 : index
    %25 = vector.load %arg7[%c0_14, %c0_15] : memref<32x6xbf16, #tpu.memory_space<vmem>>, vector<32x6xbf16>
    %c0_16 = arith.constant 0 : index
    %c0_17 = arith.constant 0 : index
    %26 = vector.load %arg8[%c0_16, %c0_17] : memref<1x6xf32, #tpu.memory_space<vmem>>, vector<1x6xf32>
    %cst_18 = arith.constant dense<0.000000e+00> : vector<8x6xf32>
    %27 = tpu.matmul %24, %25, %cst_18 {dimension_numbers = #tpu.dot_dimension_numbers<[1], [0], [0], [1], [0, 0, 1, 1], [], []>} : vector<8x32xbf16>, vector<32x6xbf16>, vector<8x6xf32> -> vector<8x6xf32>
    %28 = vector.broadcast %26 : vector<1x6xf32> to vector<8x6xf32>
    %29 = arith.addf %27, %28 : vector<8x6xf32>
    %cst_19 = arith.constant dense<0xFF800000> : vector<8xf32>
    %30 = vector.multi_reduction <maximumf>, %29, %cst_19 [1] : vector<8x6xf32> to vector<8xf32>
    %31 = vector.shape_cast %30 : vector<8xf32> to vector<8x1xf32>
    %32 = vector.broadcast %31 : vector<8x1xf32> to vector<8x6xf32>
    %33 = arith.subf %29, %32 : vector<8x6xf32>
    %34 = math.exp %33 : vector<8x6xf32>
    %cst_20 = arith.constant dense<0.000000e+00> : vector<8xf32>
    %35 = vector.multi_reduction <add>, %34, %cst_20 [1] : vector<8x6xf32> to vector<8xf32>
    %36 = vector.shape_cast %35 : vector<8xf32> to vector<8x1xf32>
    %37 = tpu.reciprocal %36 {approx = true} : vector<8x1xf32> -> vector<8x1xf32>
    %38 = vector.broadcast %37 : vector<8x1xf32> to vector<8x6xf32>
    %39 = arith.mulf %34, %38 : vector<8x6xf32>
    %c0_21 = arith.constant 0 : index
    %c0_22 = arith.constant 0 : index
    %40 = vector.load %arg2[%c0_21, %c0_22] : memref<8x6xf32, #tpu.memory_space<vmem>>, vector<8x6xf32>
    %41 = arith.addf %29, %40 : vector<8x6xf32>
    %cst_23 = arith.constant dense<0xFF800000> : vector<8xf32>
    %42 = vector.multi_reduction <maximumf>, %41, %cst_23 [1] : vector<8x6xf32> to vector<8xf32>
    %43 = vector.shape_cast %42 : vector<8xf32> to vector<8x1xf32>
    %44 = tpu.iota {dimensions = array<i32: 1>} : vector<8x6xi32>
    %45 = vector.broadcast %43 : vector<8x1xf32> to vector<8x6xf32>
    %46 = arith.cmpf oge, %41, %45 : vector<8x6xf32>
    %c6_i32 = arith.constant 6 : i32
    %47 = vector.broadcast %c6_i32 : i32 to vector<8x6xi32>
    %48 = arith.select %46, %44, %47 : vector<8x6xi1>, vector<8x6xi32>
    %cst_24 = arith.constant dense<2147483647> : vector<8xi32>
    %49 = vector.multi_reduction <minsi>, %48, %cst_24 [1] : vector<8x6xi32> to vector<8xi32>
    %50 = vector.shape_cast %49 : vector<8xi32> to vector<8x1xi32>
    %51 = vector.broadcast %50 : vector<8x1xi32> to vector<8x6xi32>
    %52 = arith.cmpi eq, %44, %51 : vector<8x6xi32>
    %53 = arith.extui %52 : vector<8x6xi1> to vector<8x6xi32>
    %54 = arith.sitofp %53 : vector<8x6xi32> to vector<8x6xf32>
    %55 = tpu.concatenate %54, %39, %29 in 1 : vector<8x6xf32>, vector<8x6xf32>, vector<8x6xf32> -> vector<8x18xf32>
    %c0_25 = arith.constant 0 : index
    %c0_26 = arith.constant 0 : index
    %56 = vector.load %arg9[%c0_25, %c0_26] : memref<8x18xf32, #tpu.memory_space<vmem>>, vector<8x18xf32>
    tpu.vector_store %arg9[%c0_25, %c0_26], %55 {strides = array<i32>} : memref<8x18xf32, #tpu.memory_space<vmem>>, vector<8x18xf32>,
    return
  }
  func.func @transform_0(%arg0: i32) -> (i32, i32) {
    %c0_i32 = arith.constant 0 : i32
    %c0_i32_0 = arith.constant 0 : i32
    return %arg0, %c0_i32 : i32, i32
  }
  func.func @transform_1(%arg0: i32) -> (i32, i32) {
    %c0_i32 = arith.constant 0 : i32
    %c0_i32_0 = arith.constant 0 : i32
    return %arg0, %c0_i32 : i32, i32
  }
  func.func @transform_2(%arg0: i32) -> (i32, i32) {
    %c0_i32 = arith.constant 0 : i32
    %c0_i32_0 = arith.constant 0 : i32
    %c0_i32_1 = arith.constant 0 : i32
    return %c0_i32, %c0_i32_0 : i32, i32
  }
  func.func @transform_3(%arg0: i32) -> (i32, i32) {
    %c0_i32 = arith.constant 0 : i32
    %c0_i32_0 = arith.constant 0 : i32
    %c0_i32_1 = arith.constant 0 : i32
    return %c0_i32, %c0_i32_0 : i32, i32
  }
  func.func @transform_4(%arg0: i32) -> (i32, i32) {
    %c0_i32 = arith.constant 0 : i32
    %c0_i32_0 = arith.constant 0 : i32
    %c0_i32_1 = arith.constant 0 : i32
    return %c0_i32, %c0_i32_0 : i32, i32
  }
  func.func @transform_5(%arg0: i32) -> (i32, i32) {
    %c0_i32 = arith.constant 0 : i32
    %c0_i32_0 = arith.constant 0 : i32
    %c0_i32_1 = arith.constant 0 : i32
    return %c0_i32, %c0_i32_0 : i32, i32
  }
  func.func @transform_6(%arg0: i32) -> (i32, i32) {
    %c0_i32 = arith.constant 0 : i32
    %c0_i32_0 = arith.constant 0 : i32
    %c0_i32_1 = arith.constant 0 : i32
    return %c0_i32, %c0_i32_0 : i32, i32
  }
  func.func @transform_7(%arg0: i32) -> (i32, i32) {
    %c0_i32 = arith.constant 0 : i32
    %c0_i32_0 = arith.constant 0 : i32
    %c0_i32_1 = arith.constant 0 : i32
    return %c0_i32, %c0_i32_0 : i32, i32
  }
  func.func @transform_8(%arg0: i32) -> (i32, i32) {
    %c0_i32 = arith.constant 0 : i32
    %c0_i32_0 = arith.constant 0 : i32
    return %arg0, %c0_i32 : i32, i32
  }
}

</mosaic_0001>

<bundles_post_ra>
// kernel: tpu_custom_call.1
= control target key start
LH: loop header
LB: loop body
LE: loop exit
PB: predicated region body
PF: predicated region fallthrough
CT: control target
= control target key end

     0   :  { %13 = vsyncpa [#allocation3], 0  ;;  %s519_s0 = inlined_call_operand.vmem [shape: bf16[8,32], index: 0, kind: input, shape index: {}]   ;;  %s520_s1 = inlined_call_operand.hbm [shape: f32[8,6], index: 1, kind: input, shape index: {}]   ;;  %s521_s2 = inlined_call_operand.vmem [shape: bf16[32,32], index: 2, kind: input, shape index: {}]   ;;  %s522_s3 = inlined_call_operand.vmem [shape: f32[1,32], index: 3, kind: input, shape index: {}]   ;;  %s523_s4 = inlined_call_operand.hbm [shape: bf16[32,32], index: 4, kind: input, shape index: {}]   ;;  %s524_s5 = inlined_call_operand.hbm [shape: f32[1,32], index: 5, kind: input, shape index: {}]   ;;  %s525_s6 = inlined_call_operand.vmem [shape: bf16[32,6], index: 6, kind: input, shape index: {}]   ;;  %s526_s7 = inlined_call_operand.vmem [shape: f32[1,6], index: 7, kind: input, shape index: {}]   ;;  %s527_s8 = inlined_call_operand.hbm [shape: f32[8,18], index: 8, kind: output, shape index: {}]  }
   0x1   :  { %14 = vsyncpa [#allocation6], 0  ;;  %s37_s29 = sshll.u32 %s523_s4, 4  ;;  %s38_s29 = int_to_ptr.hbm [resolvable:$true] %s37_s29 }
   0x2   :  { %15 = vsyncpa [#allocation4], 0  ;;  %s424_s30 = smov [#allocation5]   ;;  %s23_s12 = sshll.u32 %s520_s1, 4  ;;  %s24_s12 = int_to_ptr.hbm [resolvable:$true] %s23_s12 }
   0x3   :  { %s39_s9 = sshll.u32 %s424_s30, 4  ;;  %s425_s13 = smov 64   ;;  %s40_s9 = int_to_ptr.vmem [resolvable:$true] %s39_s9 }
   0x4   :  { %s426_s14 = smov 4   ;;  %s427_s15 = smov [#allocation2]  }
   0x5   :  { %45 = dma.hbm_to_vmem [thread:$0]  %s38_s29, 256, %s40_s9, [#allocation6], %s425_s13, %s425_s13, %s426_s14  }
   0x6   :  { %s25_s16 = sshll.u32 %s427_s15, 4  ;;  %s51_s19 = sshll.u32 %s524_s5, 4  ;;  %s26_s16 = int_to_ptr.vmem [resolvable:$true] %s25_s16  ;;  %s52_s19 = int_to_ptr.hbm [resolvable:$true] %s51_s19 }
   0x7   :  { %28 = dma.hbm_to_vmem [thread:$0]  %s24_s12, 128, %s26_s16, [#allocation3]  }
   0x8   :  { %s428_s4 = smov [#allocation7]  }
   0x9   :  { %s53_s20 = sshll.u32 %s428_s4, 4  ;;  %s54_s20 = int_to_ptr.vmem [resolvable:$true] %s53_s20 }
   0xa   :  { %56 = dma.hbm_to_vmem [thread:$0]  %s52_s19, 16, %s54_s20, [#allocation6]  }
   0xb   :  { %418 = dma.done.wait [#allocation3], 128  }
   0xc   :  { %419 = vsyncadd [#allocation3], 4294967168 }
   0xd   :  { %420 = dma.done.wait [#allocation6], 272  }
   0xe   :  { %421 = vsyncadd [#allocation6], 4294967024  ;;  %v297_v0 = vld [vmem:[%s521_s2 + $0x8] sm:$0xff]  ;;  %v296_v1 = vld [vmem:[%s521_s2] sm:$0xff]  ;;  %vm95_vm0 = vcmask 261120   ;;  %vm196_vm3 = vcmask 48128   ;;  %v213_v35 = vlaneseq }
   0xf   :  { %105 = vmatpush.bf16.msra.mxu0 %v297_v0  ;;  %v74_v2 = vld [vmem:[%s519_s0] sm:$0xf]  ;;  %v299_v3 = vld [vmem:[#allocation5 + $0x8] sm:$0xff]  ;;  %v298_v4 = vld [vmem:[#allocation5] sm:$0xff]  ;;  %s431_s30 = smov [#allocation8]   ;;  %s255_s12 = sshll.u32 %s527_s8, 4  ;;  %s256_s12 = int_to_ptr.hbm [resolvable:$true] %s255_s12 }
  0x10   :  { %147 = vmatpush.bf16.msra.mxu1 %v299_v3  ;;  %v311_v5 = vld [vmem:[%s522_s3] ss:$0 sm:$0xff]  ;;  %v301_v14 = vld [vmem:[%s525_s6 + $0x8] sm:$0xff]  ;;  %v312_v16 = vld [vmem:[#allocation7] ss:$0 sm:$0xff]  ;;  %v214_v37 = vand.u32 127, %v213_v35 }
  0x11   :  { %189 = vmatpush.bf16.msra.mxu2 %v301_v14  ;;  %v300_v15 = vld [vmem:[%s525_s6] sm:$0xff]  ;;  %s429_s6 = smov 12   ;;  %s253_s9 = sshll.u32 %s431_s30, 4  ;;  %vm244_vm7 = vcmask 97280   ;;  %v432_v57 = vmov 0.0   ;;  %vm246_vm8 = vcmask 146432   ;;  %s254_s9 = int_to_ptr.vmem [resolvable:$true] %s253_s9 }
  0x12   :  { %v313_v25 = vld [vmem:[%s526_s7] ss:$0 sm:$0xff]  ;;  %s430_s7 = smov 6  }
  0x13   :  { %106 = vmatpush.bf16.msra.mxu0 %v296_v1  ;;  %v208_v29 = vld [vmem:[#allocation2] sm:$0xff] }
  0x14   :  { %148 = vmatpush.bf16.msra.mxu1 %v298_v4 }
  0x15   :  { %190 = vmatpush.bf16.msra.mxu2 %v300_v15 }
  0x16   :  { %274 = vmatmul.msk.bf16.vlgmr.msra.gmra.mxu0 %vm95_vm0, %v74_v2 }
  0x93   :  { %v108_v6 = vpop.f32.mrf.mxu0 }
  0x94   :  { %v109_v7 = vadd.f32 %v311_v5, %v108_v6 }
  0x96   :  { %v113_v8 = vmul.f32 1.442695, %v109_v7  ;;  %vm112_vm1 = vcmp.gt.f32.partialorder %v109_v7, 0.0 }
  0x98   :  { %314 = vpow2.f32 %v113_v8 }
  0x9b   :  { %v110_v9 = vpop.f32.mrf.mxu0 }
  0x9e   :  { %v315_v10 = vpop.eup %314 }
  0x9f   :  { %v275_v11 = vadd.f32 -1.0, %v315_v10 }
  0xa1   :  { %v116_v12 = vsel %vm112_vm1, %v109_v7, %v275_v11 }
  0xa2   :  { %v117_v13 = vpack.c.bf16 %v116_v12, %v116_v12 }
  0xa4   :  { %284 = vmatmul.msk.bf16.vlgmr.msra.gmra.mxu1 %vm95_vm0, %v117_v13 }
 0x121   :  { %v150_v17 = vpop.f32.mrf.mxu1 }
 0x122   :  { %v151_v18 = vadd.f32 %v312_v16, %v150_v17 }
 0x124   :  { %v155_v19 = vmul.f32 1.442695, %v151_v18  ;;  %vm154_vm2 = vcmp.gt.f32.partialorder %v151_v18, 0.0 }
 0x126   :  { %316 = vpow2.f32 %v155_v19 }
 0x129   :  { %v152_v20 = vpop.f32.mrf.mxu1 }
 0x12c   :  { %v317_v21 = vpop.eup %316 }
 0x12d   :  { %v285_v22 = vadd.f32 -1.0, %v317_v21 }
 0x12f   :  { %v158_v23 = vsel %vm154_vm2, %v151_v18, %v285_v22 }
 0x130   :  { %v159_v24 = vpack.c.bf16 %v158_v23, %v158_v23 }
 0x132   :  { %294 = vmatmul.msk.bf16.vlgmr.msra.gmra.mxu2 %vm95_vm0, %v159_v24 }
 0x1b5   :  { %v192_v26 = vpop.f32.mrf.mxu2 }
 0x1b6   :  { %v193_v27 = vadd.f32 %v313_v25, %v192_v26 }
 0x1b8   :  { %v197_v28 = vsel %vm196_vm3, %v193_v27, -inf  ;;  %v209_v30 = vadd.f32 %v208_v29, %v193_v27 }
 0x1b9   :  { %198 = vmax.xlane.f32.xlu0 %v197_v28 }
 0x1ba   :  { %v210_v32 = vsel %vm196_vm3, %v209_v30, -inf }
 0x1bd   :  { %v194_v31 = vpop.f32.mrf.mxu2 }
 0x1c1   :  { %211 = vmax.xlane.f32.xlu0 %v210_v32 }
 0x1d5   :  { %240 = vrot.lane.b32.xlu0 %v193_v27, %s429_s6 }
 0x22c   :  { %v199_v33 = vpop.xlane.xlu0 %198 }
 0x22d   :  { %v200_v34 = vsub.f32 %v193_v27, %v199_v33 }
 0x22f   :  { %v201_v36 = vmul.f32 1.442695, %v200_v34 }
 0x231   :  { %318 = vpow2.f32 %v201_v36 }
 0x234   :  { %v212_v38 = vpop.xlane.xlu0 %211 }
 0x235   :  { %vm215_vm4 = vcmp.ge.f32.partialorder %v209_v30, %v212_v38 }
 0x236   :  { %v216_v39 = vsel %vm215_vm4, %v214_v37, 6 }
 0x237   :  { %v319_v40 = vpop.eup %318  ;;  %v217_v41 = vsel %vm196_vm3, %v216_v39, 2147483647 }
 0x238   :  { %v203_v42 = vsel %vm196_vm3, %v319_v40, 0.0  ;;  %v219_v43 = vshra.s32 %v217_v41, 16  ;;  %v218_v46 = vand.u32 65535, %v217_v41 }
 0x239   :  { %204 = vadd.xlane.f32.xlu1 %v203_v42 }
 0x23a   :  { %v221_v44 = vcvt.s32.f32 %v219_v43  ;;  %v220_v48 = vcvt.s32.f32 %v218_v46 }
 0x241   :  { %222 = vmin.xlane.f32.xlu1 %v221_v44 }
 0x247   :  { %v241_v60 = vpop.permute.xlu0 %240 }
 0x2ac   :  { %v205_v45 = vpop.xlane.xlu1 %204 }
 0x2ad   :  { %320 = vrcp.f32 %v205_v45 }
 0x2b3   :  { %v321_v50 = vpop.eup %320 }
 0x2b4   :  { %v223_v47 = vpop.xlane.xlu1 %222  ;;  %v207_v51 = vmul.f32 %v321_v50, %v319_v40 }
 0x2b5   :  { %vm224_vm5 = vcmp.eq.f32.partialorder %v221_v44, %v223_v47  ;;  %v229_v52 = vcvt.f32.s32 %v223_v47 }
 0x2b6   :  { %v225_v49 = vsel %vm224_vm5, %v220_v48, inf }
 0x2b7   :  { %226 = vmin.xlane.f32.xlu2 %v225_v49  ;;  %v230_v54 = vshll.u32 %v229_v52, 16 }
 0x2cf   :  { %236 = vrot.lane.b32.xlu2 %v207_v51, %s430_s7 }
 0x32a   :  { %v227_v53 = vpop.xlane.xlu2 %226 }
 0x32b   :  { %v228_v55 = vcvt.f32.s32 %v227_v53 }
 0x32d   :  { %v231_v56 = vadd.s32 %v230_v54, %v228_v55 }
 0x32f   :  { %vm232_vm6 = vcmp.eq.s32.totalorder %v214_v37, %v231_v56 }
 0x330   :  { %v295_v58 = vsel %vm232_vm6, 1.0, %v432_v57 }
 0x332   :  { %v237_v59 = vpop.permute.xlu2 %236 }
 0x333   :  { %v243_v61 = vsel %vm196_vm3, %v295_v58, %v237_v59 }
 0x334   :  { %v245_v62 = vsel %vm244_vm7, %v243_v61, %v241_v60 }
 0x335   :  { %247 = vst.msk [vmem:[#allocation8] sm:$0xff] %vm246_vm8, %v245_v62 }
 0x336   :  { %258 = dma.vmem_to_hbm [thread:$0]  %s254_s9, 128, %s256_s12, [#allocation4]  }
 0x337   :  { %422 = dma.done.wait [#allocation4], 128  }
 0x338   :  { %423 = vsyncadd [#allocation4], 4294967168 }
 0x339   :  { %263 = vsyncpa [#allocation3], 1 }
 0x33a   :  { %264 = vsyncpa [#allocation6], 1 }
 0x33b   :  { %265 = vsyncpa [#allocation4], 1 }

</bundles_post_ra>
